<compile_context>
chip_gen: v7x
topology: tpu7x:2x2x1
jax: 0.10.0
libtpu: 0.0.40
codegen_flags: <defaults>
</compile_context>

<pallas_src>
import math

import jax
import jax.numpy as jnp
from jax.experimental import pallas as pl
from jax.experimental.pallas import tpu as pltpu


def _resblock_kernel(p_ref, w_ref, b_ref, o_ref):
    # p_ref : (TILE_R, P*K*K*Cin)   bf16 packed im2col patches (P pixels/row), streamed
    # w_ref : (P*K*K*Cin, 2*P*Cout) bf16 block-diag [conv | residual] weights, resident
    # b_ref : (1, 2*P*Cout)         f32  [tile(b_conv, P), tile(b_res, P)],   resident
    # o_ref : (TILE_R, P*Cout)      f32  lane-dense output tile
    acc = jnp.dot(p_ref[...], w_ref[...], preferred_element_type=jnp.float32)
    acc = acc + b_ref[...]                                     # both biases, one add
    half = acc.shape[-1] // 2
    out = jnp.maximum(acc[:, :half], 0.0) + acc[:, half:]      # relu(conv) + residual
    o_ref[...] = out.astype(o_ref.dtype)                       # skip_add.add


def _vmem_limit_bytes():
    """Per-generation VMEM limit (v5e/v6e: 128 MiB physical, v7x: 64 MiB per TC)."""
    try:
        phys = int(pltpu.get_tpu_info().vmem_capacity_bytes)
    except Exception:
        phys = 64 << 20                      # conservative (v7x-sized) fallback
    return int(min(phys // 2, 64 << 20))


def residual_block_forward(x_nchw, w_conv, b_conv, w_res, b_res, *, stride,
                           max_tile_pixels=None, compute_dtype=jnp.bfloat16):
    """ResidualBlock forward (transpose=False).

    x_nchw : (N, Cin, H, W) float32
    w_conv : (K, K, Cin, Cout) HWIO weights of the 4x4 conv (pad=1, stride=stride)
    b_conv : (Cout,)
    w_res  : (Cin, Cout) 1x1 residual projection (identity matrix for nn.Identity())
    b_res  : (Cout,)     (zeros for nn.Identity())
    returns (N, Cout, Ho, Wo) float32

    NOTE: patches/weights are streamed in `compute_dtype` (default bfloat16) with
    float32 MXU accumulation -- an intentional numerics change vs. the float32
    PyTorch module (max abs error ~1e-2 at unit-scale inputs).
    """
    N, Cin, H, W = x_nchw.shape
    K = w_conv.shape[0]
    Cout = w_conv.shape[-1]
    pad = 1
    Ho = (H + 2 * pad - K) // stride + 1
    Wo = (W + 2 * pad - K) // stride + 1
    Ho_res = (H - 1) // stride + 1
    Wo_res = (W - 1) // stride + 1
    if (Ho, Wo) != (Ho_res, Wo_res):
        raise ValueError(
            f"conv output {(Ho, Wo)} and residual output {(Ho_res, Wo_res)} disagree "
            f"for stride={stride}; the PyTorch module cannot add them either.")
    M = N * Ho * Wo
    KKC = K * K * Cin

    # Lane-density parameters: pack P output pixels per LHS row so the patches block
    # (P*KKC lanes) and the output block (P*Cout lanes) are both multiples of 128.
    P = 128 // math.gcd(128, Cout)
    PC = P * Cout
    base_pix = 8 * P                          # 8 sublanes of packed rows = granularity

    # NHWC, low precision for the dominant (patches) HBM stream.
    x = jnp.transpose(x_nchw, (0, 2, 3, 1)).astype(compute_dtype)
    xp = jnp.pad(x, ((0, 0), (pad, pad), (pad, pad), (0, 0)))

    # --- glue: im2col patch extraction (all matmul/bias/ReLU work is in the kernel) ---
    # TODO(synk): fuse into the kernel with manual overlapping-window (halo) DMA.
    cols = []
    for kh in range(K):
        for kw in range(K):
            sl = jax.lax.slice(
                xp,
                (0, kh, kw, 0),
                (N, kh + stride * (Ho - 1) + 1, kw + stride * (Wo - 1) + 1, Cin),
                (1, stride, stride, 1),
            )
            cols.append(sl)                                   # (N, Ho, Wo, Cin)
    patches = jnp.stack(cols, axis=3).reshape(M, KKC)         # (M, K*K*Cin) compute_dtype

    # Fused weights: conv + residual share one contraction; both block-diagonally
    # replicated P times so one MXU pass yields P pixels x (conv | residual) columns.
    f32 = jnp.float32
    wc_flat = w_conv.reshape(KKC, Cout).astype(f32)
    tap = (1 * K + 1) * Cin                                   # (kh=1, kw=1) im2col tap rows
    wr_full = jnp.zeros((KKC, Cout), f32).at[tap:tap + Cin, :].set(w_res.astype(f32))
    eye_p = jnp.eye(P, dtype=f32)
    w_big = jnp.concatenate(
        [jnp.kron(eye_p, wc_flat), jnp.kron(eye_p, wr_full)], axis=1
    ).astype(compute_dtype)                                   # (P*KKC, 2*P*Cout)
    b_big = jnp.concatenate(
        [jnp.tile(b_conv.astype(f32), P), jnp.tile(b_res.astype(f32), P)]
    )[None, :]                                                # (1, 2*P*Cout) f32

    # --- tile sizing against the chip's VMEM (includes f32 intermediates) -------------
    cdt_bytes = jnp.dtype(compute_dtype).itemsize
    # per output pixel: double-buffered patches in + double-buffered f32 out
    # + f32 in-kernel intermediates (acc: 2*Cout, combined: Cout).
    bytes_per_pixel = 2 * KKC * cdt_bytes + 2 * Cout * 4 + 3 * Cout * 4
    fixed_bytes = 2 * (P * KKC) * (2 * PC) * cdt_bytes + 2 * (2 * PC) * 4
    vmem_limit = _vmem_limit_bytes()
    budget = max(vmem_limit - fixed_bytes - (4 << 20), 1 << 20)
    cap_pix = max(base_pix, budget // bytes_per_pixel // base_pix * base_pix)
    m_ceil = pl.cdiv(M, base_pix) * base_pix
    # keep >= ~4 grid steps on large problems so v7x's two TensorCores both get work
    par_cap = max(base_pix, pl.cdiv(pl.cdiv(M, 4), base_pix) * base_pix)
    tile_pix = min(cap_pix, m_ceil, par_cap)
    if max_tile_pixels is not None:
        tile_pix = min(tile_pix, max(base_pix, max_tile_pixels // base_pix * base_pix))
    m_pad = pl.cdiv(M, tile_pix) * tile_pix
    tile_r = tile_pix // P

    if m_pad != M:
        patches = jnp.pad(patches, ((0, m_pad - M), (0, 0)))
    patches_packed = patches.reshape(m_pad // P, P * KKC)     # lane-dense LHS rows

    out_packed = pl.pallas_call(
        _resblock_kernel,
        out_shape=jax.ShapeDtypeStruct((m_pad // P, PC), jnp.float32),
        grid_spec=pltpu.PrefetchScalarGridSpec(
            num_scalar_prefetch=0,
            grid=(m_pad // tile_pix,),
            in_specs=[
                # Streamed packed patches (lane-dense).  If DMA were still exposed on
                # v6e, pipeline_mode=pl.Buffered(3) here is the next knob to try.
                pl.BlockSpec((tile_r, P * KKC), lambda i: (i, 0)),
                pl.BlockSpec((P * KKC, 2 * PC), lambda i: (0, 0)),   # resident weights
                pl.BlockSpec((1, 2 * PC), lambda i: (0, 0)),         # resident biases
            ],
            out_specs=pl.BlockSpec((tile_r, PC), lambda i: (i, 0)),  # lane-dense output
        ),
        compiler_params=pltpu.CompilerParams(
            # Disjoint output tiles -> shard the 1-D grid across both TCs on v7x;
            # harmless on single-TC v5e/v6e.
            dimension_semantics=("parallel",),
            vmem_limit_bytes=vmem_limit,
        ),
    )(patches_packed, w_big, b_big)

    out = out_packed.reshape(m_pad, Cout)[:M].reshape(N, Ho, Wo, Cout)
    return jnp.transpose(out, (0, 3, 1, 2)).astype(x_nchw.dtype)      # back to NCHW


def _reference_forward(x_nchw, w_conv, b_conv, w_res, b_res, *, stride,
                       compute_dtype=jnp.float32):
    """Plain-JAX reference (lax.conv) matching nn.Conv2d semantics, for checking.

    Operands are optionally rounded through `compute_dtype` so the comparison
    isolates kernel correctness from the intentional bf16 quantization.
    """
    f32 = jnp.float32
    x = jnp.transpose(x_nchw, (0, 2, 3, 1)).astype(compute_dtype).astype(f32)
    wc = w_conv.astype(compute_dtype).astype(f32)
    wr = w_res.astype(compute_dtype).astype(f32)
    conv = jax.lax.conv_general_dilated(
        x, wc, (stride, stride), [(1, 1), (1, 1)],
        dimension_numbers=("NHWC", "HWIO", "NHWC"),
        precision=jax.lax.Precision.HIGHEST,
    ) + b_conv
    ident = jax.lax.conv_general_dilated(
        x, wr[None, None, :, :], (stride, stride), [(0, 0), (0, 0)],
        dimension_numbers=("NHWC", "HWIO", "NHWC"),
        precision=jax.lax.Precision.HIGHEST,
    ) + b_res
    out = jnp.maximum(conv, 0.0) + ident
    return jnp.transpose(out, (0, 3, 1, 2))


if __name__ == "__main__":
    # ResidualBlock(in_channels=4, out_channels=8, stride=2, transpose=False)
    Cin, Cout, K, stride = 4, 8, 4, 2

    key = jax.random.PRNGKey(0)
    k_x, k_wc, k_bc, k_wr, k_br, k_x2 = jax.random.split(key, 6)

    # deterministic synthetic parameters (shapes from the module's __init__)
    w_conv = jax.random.normal(k_wc, (K, K, Cin, Cout), dtype=jnp.float32) * 0.1
    b_conv = jax.random.normal(k_bc, (Cout,), dtype=jnp.float32) * 0.1
    w_res = jax.random.normal(k_wr, (Cin, Cout), dtype=jnp.float32) * 0.1    # 1x1 proj
    b_res = jax.random.normal(k_br, (Cout,), dtype=jnp.float32) * 0.1

    # Case 1: the spec's small shapes (single grid step, M = 128 packed pixels).
    N, H, W = 2, 16, 16
    x = jax.random.normal(k_x, (N, Cin, H, W), dtype=jnp.float32)
    out = jax.block_until_ready(
        residual_block_forward(x, w_conv, b_conv, w_res, b_res, stride=stride))
    ref = _reference_forward(x, w_conv, b_conv, w_res, b_res, stride=stride,
                             compute_dtype=jnp.bfloat16)
    assert out.shape == (N, Cout, H // stride, W // stride), out.shape
    err = float(jnp.max(jnp.abs(out - ref)))
    assert jnp.allclose(out, ref, atol=2e-2, rtol=2e-2), f"case1 mismatch vs ref: {err}"

    # Case 2: M = 450 (not a multiple of the tile -> exercises row padding) with
    # forced small tiles so the grid runs 4 pipelined, megacore-parallel steps.
    N2, H2, W2 = 2, 30, 30
    x2 = jax.random.normal(k_x2, (N2, Cin, H2, W2), dtype=jnp.float32)
    out2 = jax.block_until_ready(
        residual_block_forward(x2, w_conv, b_conv, w_res, b_res, stride=stride,
                               max_tile_pixels=128))
    ref2 = _reference_forward(x2, w_conv, b_conv, w_res, b_res, stride=stride,
                              compute_dtype=jnp.bfloat16)
    assert out2.shape == (N2, Cout, 15, 15), out2.shape
    err2 = float(jnp.max(jnp.abs(out2 - ref2)))
    assert jnp.allclose(out2, ref2, atol=2e-2, rtol=2e-2), f"case2 mismatch vs ref: {err2}"

    print("KERNEL_OK")
</pallas_src>

<mosaic_0001>
module attributes {stable_mosaic.version = 11 : i64} {
  func.func @_resblock_kernel(%arg0: i32, %arg1: memref<8x1024xbf16, #tpu.memory_space<vmem>>, %arg2: memref<1024x256xbf16, #tpu.memory_space<vmem>>, %arg3: memref<1x256xf32, #tpu.memory_space<vmem>>, %arg4: memref<8x128xf32, #tpu.memory_space<vmem>>) attributes {dimension_semantics = [#tpu.dimension_semantics<parallel>], iteration_bounds = array<i64: 1>, scalar_prefetch = 0 : i64, scratch_operands = 0 : i64, tpu.core_type = #tpu.core_type<tc>, window_params = [{transform_indices = @transform_0, window_bounds = array<i64: 8, 1024>}, {pipeline_mode = #tpu.pipeline_mode<synchronous>, transform_indices = @transform_1, window_bounds = array<i64: 1024, 256>}, {pipeline_mode = #tpu.pipeline_mode<synchronous>, transform_indices = @transform_2, window_bounds = array<i64: 1, 256>}, {transform_indices = @transform_3, window_bounds = array<i64: 8, 128>}]} {
    %c0 = arith.constant 0 : index
    %c0_0 = arith.constant 0 : index
    %0 = vector.load %arg1[%c0, %c0_0] : memref<8x1024xbf16, #tpu.memory_space<vmem>>, vector<8x1024xbf16>
    %c0_1 = arith.constant 0 : index
    %c0_2 = arith.constant 0 : index
    %1 = vector.load %arg2[%c0_1, %c0_2] : memref<1024x256xbf16, #tpu.memory_space<vmem>>, vector<1024x256xbf16>
    %cst = arith.constant dense<0.000000e+00> : vector<8x256xf32>
    %2 = tpu.matmul %0, %1, %cst {dimension_numbers = #tpu.dot_dimension_numbers<[1], [0], [0], [1], [0, 0, 1, 1], [], []>} : vector<8x1024xbf16>, vector<1024x256xbf16>, vector<8x256xf32> -> vector<8x256xf32>
    %c0_3 = arith.constant 0 : index
    %c0_4 = arith.constant 0 : index
    %3 = vector.load %arg3[%c0_3, %c0_4] : memref<1x256xf32, #tpu.memory_space<vmem>>, vector<1x256xf32>
    %4 = vector.broadcast %3 : vector<1x256xf32> to vector<8x256xf32>
    %5 = arith.addf %2, %4 : vector<8x256xf32>
    %6 = vector.extract_strided_slice %5 {offsets = [0, 0], sizes = [8, 128], strides = [1, 1]} : vector<8x256xf32> to vector<8x128xf32>
    %cst_5 = arith.constant 0.000000e+00 : f32
    %7 = vector.broadcast %cst_5 : f32 to vector<8x128xf32>
    %8 = arith.maximumf %6, %7 : vector<8x128xf32>
    %9 = vector.extract_strided_slice %5 {offsets = [0, 128], sizes = [8, 128], strides = [1, 1]} : vector<8x256xf32> to vector<8x128xf32>
    %10 = arith.addf %8, %9 : vector<8x128xf32>
    %c0_6 = arith.constant 0 : index
    %c0_7 = arith.constant 0 : index
    %11 = vector.load %arg4[%c0_6, %c0_7] : memref<8x128xf32, #tpu.memory_space<vmem>>, vector<8x128xf32>
    tpu.vector_store %arg4[%c0_6, %c0_7], %10 {strides = array<i32>} : memref<8x128xf32, #tpu.memory_space<vmem>>, vector<8x128xf32>,
    return
  }
  func.func @transform_0(%arg0: i32) -> (i32, i32) {
    %c0_i32 = arith.constant 0 : i32
    %c0_i32_0 = arith.constant 0 : i32
    return %arg0, %c0_i32 : i32, i32
  }
  func.func @transform_1(%arg0: i32) -> (i32, i32) {
    %c0_i32 = arith.constant 0 : i32
    %c0_i32_0 = arith.constant 0 : i32
    %c0_i32_1 = arith.constant 0 : i32
    return %c0_i32, %c0_i32_0 : i32, i32
  }
  func.func @transform_2(%arg0: i32) -> (i32, i32) {
    %c0_i32 = arith.constant 0 : i32
    %c0_i32_0 = arith.constant 0 : i32
    %c0_i32_1 = arith.constant 0 : i32
    return %c0_i32, %c0_i32_0 : i32, i32
  }
  func.func @transform_3(%arg0: i32) -> (i32, i32) {
    %c0_i32 = arith.constant 0 : i32
    %c0_i32_0 = arith.constant 0 : i32
    return %arg0, %c0_i32 : i32, i32
  }
}

</mosaic_0001>

<bundles_post_ra>
// kernel: tpu_custom_call.1
= control target key start
LH: loop header
LB: loop body
LE: loop exit
PB: predicated region body
PF: predicated region fallthrough
CT: control target
= control target key end

     0   :  { %8 = vsyncpa [#allocation3], 0  ;;  %s1532_s0 = inlined_call_operand.hbm [shape: bf16[8,1024], index: 0, kind: input, shape index: {}]   ;;  %s1533_s1 = inlined_call_operand.hbm [shape: bf16[1024,256], index: 1, kind: input, shape index: {}]   ;;  %s1534_s2 = inlined_call_operand.vmem [shape: f32[1,256], index: 2, kind: input, shape index: {}]   ;;  %s1535_s3 = inlined_call_operand.hbm [shape: f32[8,128], index: 3, kind: output, shape index: {}]  }
   0x1   :  { %9 = vsyncpa [#allocation6], 0 }
   0x2   :  { %10 = vsyncpa [#allocation4], 0  ;;  %s1449_s12 = smov [#allocation2]   ;;  %s1450_s14 = smov [#allocation5]  }
   0x3   :  { %s17_s13 = sshll.u32 %s1449_s12, 4  ;;  %s26_s15 = sshll.u32 %s1450_s14, 4  ;;  %s18_s13 = int_to_ptr.vmem [resolvable:$true] %s17_s13  ;;  %s1474_s15 = int_to_ptr.vmem [resolvable:$true] %s26_s15 }
   0x4   :  { %s1377_s18 = scalar_lea.hbm %s1532_s0, 512 }
   0x5   :  { %p1378_p0 = scmp.ne.s32.totalorder %s1532_s0, %s1377_s18  ;;  %p1381_p1 = scmp.lt.u32.totalorder %s1377_s18, %s1532_s0 }
   0x7   :  { %p1383_p2 = pnand %p1381_p1, %p1378_p0 }
   0x9   :  { %1386 = shalt.err (!%p1383_p2)
}
   0xa   :  { %s1387_s23 = scalar_lea.vmem %s18_s13, 512  ;;  %p1392_p4 = scmp.lt.s32.totalorder %s18_s13, %s18_s13 }
   0xb   :  { %p1388_p3 = scmp.ne.s32.totalorder %s18_s13, %s1387_s23  ;;  %p1393_p5 = scmp.lt.s32.totalorder %s1387_s23, %s1387_s23 }
   0xd   :  { %p1394_p6 = por %p1393_p5, %p1392_p4 }
   0xf   :  { %p1395_p7 = pnand %p1394_p6, %p1388_p3 }
  0x11   :  { %1398 = shalt.err (!%p1395_p7)
}
  0x12   :  { %20 = dma.hbm_to_vmem [thread:$0]  %s1532_s0, 512, %s18_s13, [#allocation3]  }
  0x13   :  { %s1399_s28 = scalar_lea.hbm %s1533_s1, 16384 }
  0x14   :  { %p1400_p8 = scmp.ne.s32.totalorder %s1533_s1, %s1399_s28  ;;  %p1403_p9 = scmp.lt.u32.totalorder %s1399_s28, %s1533_s1 }
  0x16   :  { %p1405_p10 = pnand %p1403_p9, %p1400_p8 }
  0x18   :  { %1408 = shalt.err (!%p1405_p10)
}
  0x19   :  { %s1409_s6 = scalar_lea.vmem %s1474_s15, 16384  ;;  %p1414_p12 = scmp.lt.s32.totalorder %s1474_s15, %s1474_s15 }
  0x1a   :  { %p1410_p11 = scmp.ne.s32.totalorder %s1474_s15, %s1409_s6  ;;  %p1415_p13 = scmp.lt.s32.totalorder %s1409_s6, %s1409_s6 }
  0x1c   :  { %p1416_p0 = por %p1415_p13, %p1414_p12 }
  0x1e   :  { %p1417_p1 = pnand %p1416_p0, %p1410_p11 }
  0x20   :  { %1420 = shalt.err (!%p1417_p1)
}
  0x21   :  { %s1451_s0 = smov 128   ;;  %s1452_s7 = smov 8  }
  0x22   :  { %32 = dma.hbm_to_vmem [thread:$0]  %s1533_s1, 16384, %s1474_s15, [#allocation6], %s1451_s0, %s1451_s0, %s1452_s7  }
  0x23   :  { %1443 = dma.done.wait [#allocation3], 512  }
  0x24   :  { %1444 = vsyncadd [#allocation3], 4294966784 }
  0x25   :  { %1445 = dma.done.wait [#allocation6], 16384  }
  0x26   :  { %1446 = vsyncadd [#allocation6], 4294950912  ;;  %v1177_v0 = vld [vmem:[#allocation5 + $0x4] ss:$8 sps:$4 sm:$0xff]   ;;  %v1181_v2 = vld [vmem:[#allocation5] ss:$8 sps:$4 sm:$0xff]  }
  0x27   :  { %v1179_v1 = vld [vmem:[#allocation5 + $0x104] ss:$8 sps:$4 sm:$0xff]   ;;  %853 = vmatprep.subr.bf16.mxu0 %v1177_v0  ;;  %v1182_v3 = vld [vmem:[#allocation5 + $0x100] ss:$8 sps:$4 sm:$0xff]   ;;  %v1183_v4 = vld [vmem:[#allocation5 + $0x14] ss:$8 sps:$4 sm:$0xff]  }
  0x28   :  { %894 = vmatprep.subr.bf16.mxu1 %v1179_v1  ;;  %854 = vmatpush1.bf16.msra.mxu0 %v1181_v2  ;;  %v1185_v5 = vld [vmem:[#allocation5 + $0x114] ss:$8 sps:$4 sm:$0xff]   ;;  %v1187_v6 = vld [vmem:[#allocation5 + $0x10] ss:$8 sps:$4 sm:$0xff]   ;;  %v1189_v8 = vld [vmem:[#allocation5 + $0x24] ss:$8 sps:$4 sm:$0xff]  }
  0x29   :  { %895 = vmatpush1.bf16.msra.mxu1 %v1182_v3  ;;  %855 = vmatprep.subr.bf16.mxu0 %v1183_v4  ;;  %v1188_v7 = vld [vmem:[#allocation5 + $0x110] ss:$8 sps:$4 sm:$0xff]   ;;  %v1191_v9 = vld [vmem:[#allocation5 + $0x124] ss:$8 sps:$4 sm:$0xff]   ;;  %v1193_v10 = vld [vmem:[#allocation5 + $0x20] ss:$8 sps:$4 sm:$0xff]  }
  0x2a   :  { %896 = vmatprep.subr.bf16.mxu1 %v1185_v5  ;;  %v1194_v11 = vld [vmem:[#allocation5 + $0x120] ss:$8 sps:$4 sm:$0xff]   ;;  %v1195_v12 = vld [vmem:[#allocation5 + $0x34] ss:$8 sps:$4 sm:$0xff]   ;;  %v1199_v14 = vld [vmem:[#allocation5 + $0x30] ss:$8 sps:$4 sm:$0xff]  }
  0x2b   :  { %v1197_v13 = vld [vmem:[#allocation5 + $0x134] ss:$8 sps:$4 sm:$0xff]   ;;  %v1200_v15 = vld [vmem:[#allocation5 + $0x130] ss:$8 sps:$4 sm:$0xff]   ;;  %v1201_v16 = vld [vmem:[#allocation5 + $0x44] ss:$8 sps:$4 sm:$0xff]  }
  0x2c   :  { %856 = vmatpush1.bf16.msra.mxu0 %v1187_v6  ;;  %v1203_v17 = vld [vmem:[#allocation5 + $0x144] ss:$8 sps:$4 sm:$0xff]   ;;  %v1205_v18 = vld [vmem:[#allocation5 + $0x40] ss:$8 sps:$4 sm:$0xff]   ;;  %v1207_v20 = vld [vmem:[#allocation5 + $0x54] ss:$8 sps:$4 sm:$0xff]  }
  0x2d   :  { %897 = vmatpush1.bf16.msra.mxu1 %v1188_v7  ;;  %857 = vmatprep.subr.bf16.mxu0 %v1189_v8  ;;  %v1206_v19 = vld [vmem:[#allocation5 + $0x140] ss:$8 sps:$4 sm:$0xff]   ;;  %v1209_v21 = vld [vmem:[#allocation5 + $0x154] ss:$8 sps:$4 sm:$0xff]   ;;  %v1211_v22 = vld [vmem:[#allocation5 + $0x50] ss:$8 sps:$4 sm:$0xff]  }
  0x2e   :  { %898 = vmatprep.subr.bf16.mxu1 %v1191_v9  ;;  %v1212_v23 = vld [vmem:[#allocation5 + $0x150] ss:$8 sps:$4 sm:$0xff]   ;;  %v1213_v24 = vld [vmem:[#allocation5 + $0x64] ss:$8 sps:$4 sm:$0xff]   ;;  %v1217_v26 = vld [vmem:[#allocation5 + $0x60] ss:$8 sps:$4 sm:$0xff]  }
  0x2f   :  { %v1215_v25 = vld [vmem:[#allocation5 + $0x164] ss:$8 sps:$4 sm:$0xff]   ;;  %v1218_v27 = vld [vmem:[#allocation5 + $0x160] ss:$8 sps:$4 sm:$0xff]   ;;  %v1219_v28 = vld [vmem:[#allocation5 + $0x74] ss:$8 sps:$4 sm:$0xff]  }
  0x30   :  { %858 = vmatpush1.bf16.msra.mxu0 %v1193_v10  ;;  %v1221_v29 = vld [vmem:[#allocation5 + $0x174] ss:$8 sps:$4 sm:$0xff]   ;;  %v1223_v30 = vld [vmem:[#allocation5 + $0x70] ss:$8 sps:$4 sm:$0xff]   ;;  %v1225_v32 = vld [vmem:[#allocation5 + $0x84] ss:$8 sps:$4 sm:$0xff]  }
  0x31   :  { %899 = vmatpush1.bf16.msra.mxu1 %v1194_v11  ;;  %859 = vmatprep.subr.bf16.mxu0 %v1195_v12  ;;  %v1224_v31 = vld [vmem:[#allocation5 + $0x170] ss:$8 sps:$4 sm:$0xff]   ;;  %v1227_v33 = vld [vmem:[#allocation5 + $0x184] ss:$8 sps:$4 sm:$0xff]   ;;  %v1229_v34 = vld [vmem:[#allocation5 + $0x80] ss:$8 sps:$4 sm:$0xff]  }
  0x32   :  { %900 = vmatprep.subr.bf16.mxu1 %v1197_v13  ;;  %v1230_v35 = vld [vmem:[#allocation5 + $0x180] ss:$8 sps:$4 sm:$0xff]   ;;  %v1231_v36 = vld [vmem:[#allocation5 + $0x94] ss:$8 sps:$4 sm:$0xff]   ;;  %v1235_v38 = vld [vmem:[#allocation5 + $0x90] ss:$8 sps:$4 sm:$0xff]  }
  0x33   :  { %v1233_v37 = vld [vmem:[#allocation5 + $0x194] ss:$8 sps:$4 sm:$0xff]   ;;  %v1236_v39 = vld [vmem:[#allocation5 + $0x190] ss:$8 sps:$4 sm:$0xff]   ;;  %v1237_v40 = vld [vmem:[#allocation5 + $0xa4] ss:$8 sps:$4 sm:$0xff]  }
  0x34   :  { %860 = vmatpush1.bf16.msra.mxu0 %v1199_v14  ;;  %v1239_v41 = vld [vmem:[#allocation5 + $0x1a4] ss:$8 sps:$4 sm:$0xff]   ;;  %v1241_v42 = vld [vmem:[#allocation5 + $0xa0] ss:$8 sps:$4 sm:$0xff]   ;;  %v1243_v44 = vld [vmem:[#allocation5 + $0xb4] ss:$8 sps:$4 sm:$0xff]  }
  0x35   :  { %901 = vmatpush1.bf16.msra.mxu1 %v1200_v15  ;;  %861 = vmatprep.subr.bf16.mxu0 %v1201_v16  ;;  %v1242_v43 = vld [vmem:[#allocation5 + $0x1a0] ss:$8 sps:$4 sm:$0xff]   ;;  %v1245_v45 = vld [vmem:[#allocation5 + $0x1b4] ss:$8 sps:$4 sm:$0xff]   ;;  %v1247_v49 = vld [vmem:[#allocation5 + $0xb0] ss:$8 sps:$4 sm:$0xff]  }
  0x36   :  { %902 = vmatprep.subr.bf16.mxu1 %v1203_v17  ;;  %v41_v46 = vld [vmem:[#allocation2] sm:$0xff]  ;;  %v42_v48 = vld [vmem:[#allocation2 + $0x8] sm:$0xff]  ;;  %v1248_v50 = vld [vmem:[#allocation5 + $0x1b0] ss:$8 sps:$4 sm:$0xff]  }
  0x37   :  { %v1037_v47 = vcombine.high %v41_v46, %v41_v46  ;;  %v1039_v51 = vcombine.high %v42_v48, %v42_v48  ;;  %v1249_v52 = vld [vmem:[#allocation5 + $0xc4] ss:$8 sps:$4 sm:$0xff]   ;;  %v1253_v54 = vld [vmem:[#allocation5 + $0xc0] ss:$8 sps:$4 sm:$0xff]   ;;  %v1255_v56 = vld [vmem:[#allocation5 + $0xd4] ss:$8 sps:$4 sm:$0xff]   ;;  %v1036_v6 = vcombine.low %v41_v46, %v41_v46  ;;  %v1038_v7 = vcombine.low %v42_v48, %v42_v48 }
  0x38   :  { %862 = vmatpush1.bf16.msra.mxu0 %v1205_v18  ;;  %v1251_v53 = vld [vmem:[#allocation5 + $0x1c4] ss:$8 sps:$4 sm:$0xff]   ;;  %v1254_v55 = vld [vmem:[#allocation5 + $0x1c0] ss:$8 sps:$4 sm:$0xff]   ;;  %v1257_v57 = vld [vmem:[#allocation5 + $0x1d4] ss:$8 sps:$4 sm:$0xff]  }
  0x39   :  { %903 = vmatpush1.bf16.msra.mxu1 %v1206_v19  ;;  %863 = vmatprep.subr.bf16.mxu0 %v1207_v20  ;;  %v1259_v58 = vld [vmem:[#allocation5 + $0xd0] ss:$8 sps:$4 sm:$0xff]   ;;  %v1261_v60 = vld [vmem:[#allocation5 + $0xe4] ss:$8 sps:$4 sm:$0xff]   ;;  %v1265_v62 = vld [vmem:[#allocation5 + $0xe0] ss:$8 sps:$4 sm:$0xff]  }
  0x3a   :  { %904 = vmatprep.subr.bf16.mxu1 %v1209_v21  ;;  %885 = vmatprep.mubr.bf16.mxu0 %v1037_v47  ;;  %v1260_v59 = vld [vmem:[#allocation5 + $0x1d0] ss:$8 sps:$4 sm:$0xff]   ;;  %v1263_v61 = vld [vmem:[#allocation5 + $0x1e4] ss:$8 sps:$4 sm:$0xff]   ;;  %v1266_v63 = vld [vmem:[#allocation5 + $0x1e0] ss:$8 sps:$4 sm:$0xff]  }
  0x3b   :  { %926 = vmatprep.mubr.bf16.mxu1 %v1039_v51  ;;  %v1267_v0 = vld [vmem:[#allocation5 + $0xf4] ss:$8 sps:$4 sm:$0xff]   ;;  %v1271_v2 = vld [vmem:[#allocation5 + $0xf0] ss:$8 sps:$4 sm:$0xff]   ;;  %v1279_v4 = vld [vmem:[#allocation5 + $0x204] ss:$8 sps:$4 sm:$0xff]  }
  0x3c   :  { %864 = vmatpush1.bf16.msra.mxu0 %v1211_v22  ;;  %v1269_v1 = vld [vmem:[#allocation5 + $0x1f4] ss:$8 sps:$4 sm:$0xff]   ;;  %v1272_v3 = vld [vmem:[#allocation5 + $0x1f0] ss:$8 sps:$4 sm:$0xff]   ;;  %v1282_v5 = vld [vmem:[#allocation5 + $0x304] ss:$8 sps:$4 sm:$0xff]  }
  0x3d   :  { %905 = vmatpush1.bf16.msra.mxu1 %v1212_v23  ;;  %865 = vmatprep.subr.bf16.mxu0 %v1213_v24  ;;  %v1277_v8 = vld [vmem:[#allocation5 + $0x200] ss:$8 sps:$4 sm:$0xff]   ;;  %v1285_v10 = vld [vmem:[#allocation5 + $0x214] ss:$8 sps:$4 sm:$0xff]   ;;  %v1283_v12 = vld [vmem:[#allocation5 + $0x210] ss:$8 sps:$4 sm:$0xff]  }
  0x3e   :  { %906 = vmatprep.subr.bf16.mxu1 %v1215_v25  ;;  %v1280_v9 = vld [vmem:[#allocation5 + $0x300] ss:$8 sps:$4 sm:$0xff]   ;;  %v1288_v11 = vld [vmem:[#allocation5 + $0x314] ss:$8 sps:$4 sm:$0xff]   ;;  %v1286_v13 = vld [vmem:[#allocation5 + $0x310] ss:$8 sps:$4 sm:$0xff]  }
  0x3f   :  { %v1291_v14 = vld [vmem:[#allocation5 + $0x224] ss:$8 sps:$4 sm:$0xff]   ;;  %v1289_v16 = vld [vmem:[#allocation5 + $0x220] ss:$8 sps:$4 sm:$0xff]   ;;  %v1297_v18 = vld [vmem:[#allocation5 + $0x234] ss:$8 sps:$4 sm:$0xff]  }
  0x40   :  { %866 = vmatpush1.bf16.msra.mxu0 %v1217_v26  ;;  %v1294_v15 = vld [vmem:[#allocation5 + $0x324] ss:$8 sps:$4 sm:$0xff]   ;;  %v1292_v17 = vld [vmem:[#allocation5 + $0x320] ss:$8 sps:$4 sm:$0xff]   ;;  %v1300_v19 = vld [vmem:[#allocation5 + $0x334] ss:$8 sps:$4 sm:$0xff]  }
  0x41   :  { %907 = vmatpush1.bf16.msra.mxu1 %v1218_v27  ;;  %867 = vmatprep.subr.bf16.mxu0 %v1219_v28  ;;  %v1295_v20 = vld [vmem:[#allocation5 + $0x230] ss:$8 sps:$4 sm:$0xff]   ;;  %v1303_v22 = vld [vmem:[#allocation5 + $0x244] ss:$8 sps:$4 sm:$0xff]   ;;  %v1301_v24 = vld [vmem:[#allocation5 + $0x240] ss:$8 sps:$4 sm:$0xff]  }
  0x42   :  { %908 = vmatprep.subr.bf16.mxu1 %v1221_v29  ;;  %v1298_v21 = vld [vmem:[#allocation5 + $0x330] ss:$8 sps:$4 sm:$0xff]   ;;  %v1306_v23 = vld [vmem:[#allocation5 + $0x344] ss:$8 sps:$4 sm:$0xff]   ;;  %v1304_v25 = vld [vmem:[#allocation5 + $0x340] ss:$8 sps:$4 sm:$0xff]  }
  0x43   :  { %v1309_v26 = vld [vmem:[#allocation5 + $0x254] ss:$8 sps:$4 sm:$0xff]   ;;  %v1307_v28 = vld [vmem:[#allocation5 + $0x250] ss:$8 sps:$4 sm:$0xff]   ;;  %v1342_v51 = vld [vmem:[#allocation5 + $0x3a4] ss:$8 sps:$4 sm:$0xff]  }
  0x44   :  { %868 = vmatpush1.bf16.msra.mxu0 %v1223_v30  ;;  %v1312_v27 = vld [vmem:[#allocation5 + $0x354] ss:$8 sps:$4 sm:$0xff]   ;;  %v1310_v29 = vld [vmem:[#allocation5 + $0x350] ss:$8 sps:$4 sm:$0xff]   ;;  %v1315_v30 = vld [vmem:[#allocation5 + $0x264] ss:$8 sps:$4 sm:$0xff]  }
  0x45   :  { %909 = vmatpush1.bf16.msra.mxu1 %v1224_v31  ;;  %869 = vmatprep.subr.bf16.mxu0 %v1225_v32  ;;  %v1318_v31 = vld [vmem:[#allocation5 + $0x364] ss:$8 sps:$4 sm:$0xff]   ;;  %v1505_v32 = vld [vmem:[#allocation2 + $0x10] sm:$0xff] }
  0x46   :  { %910 = vmatprep.subr.bf16.mxu1 %v1227_v33  ;;  %v1507_v33 = vld [vmem:[#allocation2 + $0x18] sm:$0xff] }
  0x47   :  { %v1333_v46 = vld [vmem:[#allocation5 + $0x294] ss:$8 sps:$4 sm:$0xff]   ;;  %v1331_v48 = vld [vmem:[#allocation5 + $0x290] ss:$8 sps:$4 sm:$0xff]  }
  0x48   :  { %870 = vmatpush1.bf16.msra.mxu0 %v1229_v34  ;;  %v1041_v34 = vcombine.high %v1505_v32, %v1505_v32  ;;  %v1336_v47 = vld [vmem:[#allocation5 + $0x394] ss:$8 sps:$4 sm:$0xff]  }
  0x49   :  { %911 = vmatpush1.bf16.msra.mxu1 %v1230_v35  ;;  %871 = vmatprep.subr.bf16.mxu0 %v1231_v36  ;;  %v1043_v35 = vcombine.high %v1507_v33, %v1507_v33  ;;  %v1313_v36 = vld [vmem:[#allocation5 + $0x260] ss:$8 sps:$4 sm:$0xff]  }
  0x4a   :  { %912 = vmatprep.subr.bf16.mxu1 %v1233_v37  ;;  %v1316_v37 = vld [vmem:[#allocation5 + $0x360] ss:$8 sps:$4 sm:$0xff]  }
  0x4c   :  { %872 = vmatpush1.bf16.msra.mxu0 %v1235_v38  ;;  %v1321_v38 = vld [vmem:[#allocation5 + $0x274] ss:$8 sps:$4 sm:$0xff]  }
  0x4d   :  { %913 = vmatpush1.bf16.msra.mxu1 %v1236_v39  ;;  %873 = vmatprep.subr.bf16.mxu0 %v1237_v40  ;;  %v1324_v39 = vld [vmem:[#allocation5 + $0x374] ss:$8 sps:$4 sm:$0xff]   ;;  %v1319_v40 = vld [vmem:[#allocation5 + $0x270] ss:$8 sps:$4 sm:$0xff]  }
  0x4e   :  { %914 = vmatprep.subr.bf16.mxu1 %v1239_v41  ;;  %v1322_v41 = vld [vmem:[#allocation5 + $0x370] ss:$8 sps:$4 sm:$0xff]  }
  0x50   :  { %874 = vmatpush1.bf16.msra.mxu0 %v1241_v42  ;;  %v1327_v42 = vld [vmem:[#allocation5 + $0x284] ss:$8 sps:$4 sm:$0xff]  }
  0x51   :  { %915 = vmatpush1.bf16.msra.mxu1 %v1242_v43  ;;  %875 = vmatprep.subr.bf16.mxu0 %v1243_v44  ;;  %v1330_v43 = vld [vmem:[#allocation5 + $0x384] ss:$8 sps:$4 sm:$0xff]   ;;  %v1325_v44 = vld [vmem:[#allocation5 + $0x280] ss:$8 sps:$4 sm:$0xff]  }
  0x52   :  { %916 = vmatprep.subr.bf16.mxu1 %v1245_v45  ;;  %v1328_v45 = vld [vmem:[#allocation5 + $0x380] ss:$8 sps:$4 sm:$0xff]  }
  0x54   :  { %876 = vmatpush1.bf16.msra.mxu0 %v1247_v49  ;;  %v1334_v49 = vld [vmem:[#allocation5 + $0x390] ss:$8 sps:$4 sm:$0xff]  }
  0x55   :  { %917 = vmatpush1.bf16.msra.mxu1 %v1248_v50  ;;  %877 = vmatprep.subr.bf16.mxu0 %v1249_v52  ;;  %v1339_v50 = vld [vmem:[#allocation5 + $0x2a4] ss:$8 sps:$4 sm:$0xff]   ;;  %v1337_v52 = vld [vmem:[#allocation5 + $0x2a0] ss:$8 sps:$4 sm:$0xff]  }
  0x56   :  { %918 = vmatprep.subr.bf16.mxu1 %v1251_v53  ;;  %v1340_v53 = vld [vmem:[#allocation5 + $0x3a0] ss:$8 sps:$4 sm:$0xff]  }
  0x58   :  { %878 = vmatpush1.bf16.msra.mxu0 %v1253_v54  ;;  %v1345_v54 = vld [vmem:[#allocation5 + $0x2b4] ss:$8 sps:$4 sm:$0xff]  }
  0x59   :  { %919 = vmatpush1.bf16.msra.mxu1 %v1254_v55  ;;  %879 = vmatprep.subr.bf16.mxu0 %v1255_v56  ;;  %v1348_v55 = vld [vmem:[#allocation5 + $0x3b4] ss:$8 sps:$4 sm:$0xff]   ;;  %v1343_v56 = vld [vmem:[#allocation5 + $0x2b0] ss:$8 sps:$4 sm:$0xff]  }
  0x5a   :  { %920 = vmatprep.subr.bf16.mxu1 %v1257_v57  ;;  %v1346_v57 = vld [vmem:[#allocation5 + $0x3b0] ss:$8 sps:$4 sm:$0xff]  }
  0x5c   :  { %880 = vmatpush1.bf16.msra.mxu0 %v1259_v58  ;;  %v1351_v58 = vld [vmem:[#allocation5 + $0x2c4] ss:$8 sps:$4 sm:$0xff]  }
  0x5d   :  { %921 = vmatpush1.bf16.msra.mxu1 %v1260_v59  ;;  %881 = vmatprep.subr.bf16.mxu0 %v1261_v60  ;;  %v1354_v59 = vld [vmem:[#allocation5 + $0x3c4] ss:$8 sps:$4 sm:$0xff]   ;;  %v1349_v60 = vld [vmem:[#allocation5 + $0x2c0] ss:$8 sps:$4 sm:$0xff]  }
  0x5e   :  { %922 = vmatprep.subr.bf16.mxu1 %v1263_v61  ;;  %v1352_v61 = vld [vmem:[#allocation5 + $0x3c0] ss:$8 sps:$4 sm:$0xff]  }
  0x60   :  { %882 = vmatpush1.bf16.msra.mxu0 %v1265_v62  ;;  %v1357_v62 = vld [vmem:[#allocation5 + $0x2d4] ss:$8 sps:$4 sm:$0xff]  }
  0x61   :  { %923 = vmatpush1.bf16.msra.mxu1 %v1266_v63  ;;  %883 = vmatprep.subr.bf16.mxu0 %v1267_v0  ;;  %v1360_v63 = vld [vmem:[#allocation5 + $0x3d4] ss:$8 sps:$4 sm:$0xff]   ;;  %v1355_v0 = vld [vmem:[#allocation5 + $0x2d0] ss:$8 sps:$4 sm:$0xff]  }
  0x62   :  { %924 = vmatprep.subr.bf16.mxu1 %v1269_v1  ;;  %v1358_v1 = vld [vmem:[#allocation5 + $0x3d0] ss:$8 sps:$4 sm:$0xff]  }
  0x64   :  { %884 = vmatpush1.bf16.msra.mxu0 %v1271_v2  ;;  %v1363_v2 = vld [vmem:[#allocation5 + $0x2e4] ss:$8 sps:$4 sm:$0xff]  }
  0x65   :  { %925 = vmatpush1.bf16.msra.mxu1 %v1272_v3  ;;  %935 = vmatprep.subr.bf16.mxu0 %v1279_v4  ;;  %v1366_v3 = vld [vmem:[#allocation5 + $0x3e4] ss:$8 sps:$4 sm:$0xff]   ;;  %v1361_v4 = vld [vmem:[#allocation5 + $0x2e0] ss:$8 sps:$4 sm:$0xff]  }
  0x66   :  { %976 = vmatprep.subr.bf16.mxu1 %v1282_v5  ;;  %v1364_v5 = vld [vmem:[#allocation5 + $0x3e0] ss:$8 sps:$4 sm:$0xff]  }
  0x67   :  { %886 = vmatmul.mubr.bf16.vlgmr.msra.gmra.mrb[0].mxu0 %v1036_v6  ;;  %v1369_v6 = vld [vmem:[#allocation5 + $0x2f4] ss:$8 sps:$4 sm:$0xff]  }
  0x68   :  { %927 = vmatmul.mubr.bf16.vlgmr.msra.gmra.mrb[0].mxu1 %v1038_v7  ;;  %936 = vmatpush1.bf16.msra.mxu0 %v1277_v8  ;;  %v1372_v7 = vld [vmem:[#allocation5 + $0x3f4] ss:$8 sps:$4 sm:$0xff]   ;;  %v1367_v8 = vld [vmem:[#allocation5 + $0x2f0] ss:$8 sps:$4 sm:$0xff]  }
  0x69   :  { %977 = vmatpush1.bf16.msra.mxu1 %v1280_v9  ;;  %937 = vmatprep.subr.bf16.mxu0 %v1285_v10  ;;  %v1370_v9 = vld [vmem:[#allocation5 + $0x3f0] ss:$8 sps:$4 sm:$0xff]   ;;  %v1040_v10 = vcombine.low %v1505_v32, %v1505_v32 }
  0x6a   :  { %978 = vmatprep.subr.bf16.mxu1 %v1288_v11  ;;  %967 = vmatprep.mubr.bf16.mxu0 %v1041_v34  ;;  %v1042_v11 = vcombine.low %v1507_v33, %v1507_v33 }
  0x6b   :  { %1008 = vmatprep.mubr.bf16.mxu1 %v1043_v35 }
  0x6c   :  { %938 = vmatpush1.bf16.msra.mxu0 %v1283_v12  ;;  %v175_v12 = vlaneseq }
  0x6d   :  { %979 = vmatpush1.bf16.msra.mxu1 %v1286_v13  ;;  %939 = vmatprep.subr.bf16.mxu0 %v1291_v14 }
  0x6e   :  { %980 = vmatprep.subr.bf16.mxu1 %v1294_v15  ;;  %v176_v13 = vshrl.u32 %v175_v12, 7  ;;  %v173_v15 = vld [vmem:[%s1534_s2] sm:$0x3]  ;;  %s1453_s2 = smov [#allocation7]  }
  0x6f   :  { %s1026_s11 = sshll.u32 %s1453_s2, 4  ;;  %s1027_s11 = int_to_ptr.vmem [resolvable:$true] %s1026_s11 }
  0x70   :  { %940 = vmatpush1.bf16.msra.mxu0 %v1289_v16  ;;  %v177_v14 = vsub.s32 0, %v176_v13  ;;  %v181_v16 = vsub.s32 1, %v176_v13  ;;  %s1421_s12 = scalar_lea.vmem %s1027_s11, 128  ;;  %p1426_p3 = scmp.lt.s32.totalorder %s1027_s11, %s1027_s11 }
  0x71   :  { %981 = vmatpush1.bf16.msra.mxu1 %v1292_v17  ;;  %941 = vmatprep.subr.bf16.mxu0 %v1297_v18  ;;  %p1422_p2 = scmp.ne.s32.totalorder %s1027_s11, %s1421_s12  ;;  %p1427_p4 = scmp.lt.s32.totalorder %s1421_s12, %s1421_s12 }
  0x72   :  { %982 = vmatprep.subr.bf16.mxu1 %v1300_v19  ;;  %v178_v17 = vrot.slane %v173_v15, %v177_v14  ;;  %v182_v18 = vrot.slane %v173_v15, %v181_v16 }
  0x73   :  { %p1428_p5 = por %p1427_p4, %p1426_p3 }
  0x74   :  { %942 = vmatpush1.bf16.msra.mxu0 %v1295_v20 }
  0x75   :  { %983 = vmatpush1.bf16.msra.mxu1 %v1298_v21  ;;  %943 = vmatprep.subr.bf16.mxu0 %v1303_v22  ;;  %p1429_p6 = pnand %p1428_p5, %p1422_p2 }
  0x76   :  { %984 = vmatprep.subr.bf16.mxu1 %v1306_v23 }
  0x78   :  { %944 = vmatpush1.bf16.msra.mxu0 %v1301_v24 }
  0x79   :  { %985 = vmatpush1.bf16.msra.mxu1 %v1304_v25  ;;  %945 = vmatprep.subr.bf16.mxu0 %v1309_v26 }
  0x7a   :  { %986 = vmatprep.subr.bf16.mxu1 %v1312_v27 }
  0x7c   :  { %946 = vmatpush1.bf16.msra.mxu0 %v1307_v28 }
  0x7d   :  { %987 = vmatpush1.bf16.msra.mxu1 %v1310_v29  ;;  %947 = vmatprep.subr.bf16.mxu0 %v1315_v30 }
  0x7e   :  { %988 = vmatprep.subr.bf16.mxu1 %v1318_v31 }
  0x80   :  { %948 = vmatpush1.bf16.msra.mxu0 %v1313_v36 }
  0x81   :  { %989 = vmatpush1.bf16.msra.mxu1 %v1316_v37  ;;  %949 = vmatprep.subr.bf16.mxu0 %v1321_v38 }
  0x82   :  { %990 = vmatprep.subr.bf16.mxu1 %v1324_v39 }
  0x84   :  { %950 = vmatpush1.bf16.msra.mxu0 %v1319_v40 }
  0x85   :  { %991 = vmatpush1.bf16.msra.mxu1 %v1322_v41  ;;  %951 = vmatprep.subr.bf16.mxu0 %v1327_v42 }
  0x86   :  { %992 = vmatprep.subr.bf16.mxu1 %v1330_v43 }
  0x88   :  { %952 = vmatpush1.bf16.msra.mxu0 %v1325_v44 }
  0x89   :  { %993 = vmatpush1.bf16.msra.mxu1 %v1328_v45  ;;  %953 = vmatprep.subr.bf16.mxu0 %v1333_v46 }
  0x8a   :  { %994 = vmatprep.subr.bf16.mxu1 %v1336_v47 }
  0x8c   :  { %954 = vmatpush1.bf16.msra.mxu0 %v1331_v48 }
  0x8d   :  { %995 = vmatpush1.bf16.msra.mxu1 %v1334_v49  ;;  %955 = vmatprep.subr.bf16.mxu0 %v1339_v50 }
  0x8e   :  { %996 = vmatprep.subr.bf16.mxu1 %v1342_v51 }
  0x90   :  { %956 = vmatpush1.bf16.msra.mxu0 %v1337_v52 }
  0x91   :  { %997 = vmatpush1.bf16.msra.mxu1 %v1340_v53  ;;  %957 = vmatprep.subr.bf16.mxu0 %v1345_v54 }
  0x92   :  { %998 = vmatprep.subr.bf16.mxu1 %v1348_v55 }
  0x94   :  { %958 = vmatpush1.bf16.msra.mxu0 %v1343_v56 }
  0x95   :  { %999 = vmatpush1.bf16.msra.mxu1 %v1346_v57  ;;  %959 = vmatprep.subr.bf16.mxu0 %v1351_v58 }
  0x96   :  { %1000 = vmatprep.subr.bf16.mxu1 %v1354_v59 }
  0x98   :  { %960 = vmatpush1.bf16.msra.mxu0 %v1349_v60 }
  0x99   :  { %1001 = vmatpush1.bf16.msra.mxu1 %v1352_v61  ;;  %961 = vmatprep.subr.bf16.mxu0 %v1357_v62 }
  0x9a   :  { %1002 = vmatprep.subr.bf16.mxu1 %v1360_v63 }
  0x9c   :  { %962 = vmatpush1.bf16.msra.mxu0 %v1355_v0 }
  0x9d   :  { %1003 = vmatpush1.bf16.msra.mxu1 %v1358_v1  ;;  %963 = vmatprep.subr.bf16.mxu0 %v1363_v2 }
  0x9e   :  { %1004 = vmatprep.subr.bf16.mxu1 %v1366_v3 }
  0xa0   :  { %964 = vmatpush1.bf16.msra.mxu0 %v1361_v4 }
  0xa1   :  { %1005 = vmatpush1.bf16.msra.mxu1 %v1364_v5  ;;  %965 = vmatprep.subr.bf16.mxu0 %v1369_v6 }
  0xa2   :  { %1006 = vmatprep.subr.bf16.mxu1 %v1372_v7 }
  0xa4   :  { %966 = vmatpush1.bf16.msra.mxu0 %v1367_v8 }
  0xa5   :  { %1007 = vmatpush1.bf16.msra.mxu1 %v1370_v9 }
  0xa7   :  { %968 = vmatmul.mubr.bf16.vlgmr.msra.gmra.mrb[4].mxu0 %v1040_v10 }
  0xa8   :  { %1009 = vmatmul.mubr.bf16.vlgmr.msra.gmra.mrb[4].mxu1 %v1042_v11 }
 0x13a   :  { %v887_v19 = vpop.f32.mrb[0].mxu0 }
 0x13b   :  { %v928_v20 = vpop.f32.mrb[0].mxu1  ;;  %v888_v21 = vadd.f32 %v887_v19, %v178_v17  ;;  %v889_v22 = vpop.f32.mrb[1].mxu0 }
 0x13c   :  { %v930_v23 = vpop.f32.mrb[1].mxu1  ;;  %v890_v24 = vadd.f32 %v889_v22, %v182_v18  ;;  %v891_v25 = vpop.f32.mrb[2].mxu0 }
 0x13d   :  { %v932_v26 = vpop.f32.mrb[2].mxu1  ;;  %v929_v27 = vadd.f32 %v928_v20, %v888_v21  ;;  %v892_v28 = vpop.f32.mrb[3].mxu0 }
 0x13e   :  { %v933_v29 = vpop.f32.mrb[3].mxu1  ;;  %v931_v30 = vadd.f32 %v930_v23, %v890_v24 }
 0x17a   :  { %v969_v31 = vpop.f32.mrb[4].mxu0 }
 0x17b   :  { %v1010_v32 = vpop.f32.mrb[4].mxu1  ;;  %v970_v33 = vadd.f32 %v969_v31, %v929_v27  ;;  %v971_v34 = vpop.f32.mrb[5].mxu0 }
 0x17c   :  { %v1012_v35 = vpop.f32.mrb[5].mxu1  ;;  %v972_v36 = vadd.f32 %v971_v34, %v931_v30  ;;  %v973_v37 = vpop.f32.mrb[6].mxu0 }
 0x17d   :  { %v1014_v38 = vpop.f32.mrb[6].mxu1  ;;  %v1011_v39 = vadd.f32 %v1010_v32, %v970_v33  ;;  %v974_v40 = vpop.f32.mrb[7].mxu0 }
 0x17e   :  { %v1015_v41 = vpop.f32.mrb[7].mxu1  ;;  %v1013_v42 = vadd.f32 %v1012_v35, %v972_v36 }
 0x17f   :  { %v1017_v43 = vmax.f32 %v1011_v39, 0.0 }
 0x181   :  { %v1018_v44 = vadd.f32 %v1017_v43, %v1013_v42 }
 0x183   :  { %1019 = vst [vmem:[#allocation7] sm:$0xff] %v1018_v44 }
 0x184   :  { %1432 = shalt.err (!%p1429_p6)
}
 0x185   :  { %s1433_s15 = scalar_lea.hbm %s1535_s3, 128 }
 0x186   :  { %p1434_p7 = scmp.ne.s32.totalorder %s1535_s3, %s1433_s15  ;;  %p1437_p8 = scmp.lt.u32.totalorder %s1433_s15, %s1535_s3 }
 0x188   :  { %p1439_p9 = pnand %p1437_p8, %p1434_p7 }
 0x18a   :  { %1442 = shalt.err (!%p1439_p9)
}
 0x18b   :  { %1029 = dma.vmem_to_hbm [thread:$0]  %s1027_s11, 128, %s1535_s3, [#allocation4]  }
 0x18c   :  { %1447 = dma.done.wait [#allocation4], 128  }
 0x18d   :  { %1448 = vsyncadd [#allocation4], 4294967168 }
 0x18e   :  { %1033 = vsyncpa [#allocation3], 1 }
 0x18f   :  { %1034 = vsyncpa [#allocation6], 1 }
 0x190   :  { %1035 = vsyncpa [#allocation4], 1 }

</bundles_post_ra>
